<compile_context>
chip_gen: v7x
topology: tpu7x:2x2x1
jax: 0.10.0
libtpu: 0.0.40
codegen_flags: <defaults>
</compile_context>

<pallas_src>
import functools
import math

import jax
import jax.numpy as jnp
from jax.experimental import pallas as pl
from jax.experimental.pallas import tpu as pltpu


def _rmlm_kernel(f_ref, rf_ref, g_ref, rg_ref, out_ref, *, scale):
    # Both matmuls hit the MXU with f32 accumulation; elementwise product on VPU.
    fr = jnp.dot(f_ref[...], rf_ref[...], preferred_element_type=jnp.float32)
    gr = jnp.dot(g_ref[...], rg_ref[...], preferred_element_type=jnp.float32)
    prod = fr * gr
    if scale != 1.0:  # static (trace-time) branch; skipped when scale is folded into Rf
        prod = prod * scale
    out_ref[...] = prod.astype(out_ref.dtype)


def _choose_tile_n(output_dim, features_dim, num_classes, batch,
                   in_itemsize, vmem_budget_bytes):
    """Largest lane-dense output tile (multiple of 128) fitting the VMEM budget."""
    out_itemsize = 4  # f32 output
    # f and g are loaded whole every grid step (double-buffered by the pipeline).
    fixed = 2 * batch * (features_dim + num_classes) * in_itemsize
    # Per output column: one Rf column + one Rg column + one out column, x2 buffers.
    per_col = 2 * ((features_dim + num_classes) * in_itemsize + batch * out_itemsize)
    avail = max(vmem_budget_bytes - fixed, 128 * per_col)
    tile = (avail // per_col) // 128 * 128
    padded_out = -(-output_dim // 128) * 128
    tile = int(max(128, min(tile, padded_out)))
    # Keep >= 2 grid steps when possible so the "parallel" axis can be sharded
    # across v7x's two TensorCores (on v5e/v6e two tiny steps cost ~0.7 us — noise).
    if tile >= output_dim and output_dim > 128:
        half = -(-output_dim // 2)
        tile = -(-half // 128) * 128
    # Prefer a tile that divides output_dim exactly (avoid a ragged last block).
    if output_dim % 128 == 0:
        while output_dim % tile != 0 and tile > 128:
            tile -= 128
    return tile


def randomized_multi_linear_map(f, g, Rf, Rg, *, scale=None, tile_n=None,
                                compute_dtype=jnp.bfloat16,
                                vmem_budget_bytes=32 * 1024 * 1024):
    """T(f, g) = (f @ Rf) * (g @ Rg) * scale, with scale = 1/sqrt(output_dim) by default.

    Pass scale=1.0 if 1/sqrt(output_dim) has already been folded into Rf at
    construction time (recommended — removes a per-tile multiply in the kernel).
    """
    B, features_dim = f.shape
    _, num_classes = g.shape
    output_dim = Rf.shape[1]
    assert Rf.shape == (features_dim, output_dim)
    assert Rg.shape == (num_classes, output_dim)

    if scale is None:
        scale = 1.0 / math.sqrt(float(output_dim))

    # bf16 operands halve HBM traffic on the dominant Rf stream and double MXU
    # throughput on all generations; accumulation stays f32 inside the kernel.
    f = f.astype(compute_dtype)
    g = g.astype(compute_dtype)
    Rf = Rf.astype(compute_dtype)
    Rg = Rg.astype(compute_dtype)

    in_itemsize = jnp.dtype(compute_dtype).itemsize
    if tile_n is None:
        tile_n = _choose_tile_n(output_dim, features_dim, num_classes, B,
                                in_itemsize, vmem_budget_bytes)
    tile_n = int(min(tile_n, -(-output_dim // 128) * 128))
    grid_len = -(-output_dim // tile_n)  # ceil-div; Pallas masks a ragged last block

    kernel = functools.partial(_rmlm_kernel, scale=float(scale))

    return pl.pallas_call(
        kernel,
        out_shape=jax.ShapeDtypeStruct((B, output_dim), jnp.float32),
        grid_spec=pltpu.PrefetchScalarGridSpec(
            num_scalar_prefetch=0,
            grid=(grid_len,),
            in_specs=[
                # f and g are small: full (B, K) block resident every step.
                pl.BlockSpec((B, features_dim), lambda j: (0, 0)),
                # Random projection matrices tiled along the output (lane) dim.
                pl.BlockSpec((features_dim, tile_n), lambda j: (0, j)),
                pl.BlockSpec((B, num_classes), lambda j: (0, 0)),
                pl.BlockSpec((num_classes, tile_n), lambda j: (0, j)),
            ],
            out_specs=pl.BlockSpec((B, tile_n), lambda j: (0, j)),
        ),
        compiler_params=pltpu.CompilerParams(
            dimension_semantics=("parallel",),
            # Raise the scoped-VMEM cap (v5e default is 16 MiB) but stay well below
            # v7x's 64 MiB physical VMEM per TensorCore.
            vmem_limit_bytes=int(min(vmem_budget_bytes + (8 << 20), 48 << 20)),
        ),
    )(f, Rf, g, Rg)

    # TODO(synk): if batch ever grows beyond ~128, add a second grid dimension over B.


def reference(f, g, Rf, Rg):
    output_dim = Rf.shape[1]
    return (f @ Rf) * (g @ Rg) / jnp.sqrt(float(output_dim))


def reference_bf16(f, g, Rf_scaled, Rg):
    # Same bf16 casts as the default kernel path, f32 accumulation.
    fr = jnp.dot(f.astype(jnp.bfloat16), Rf_scaled.astype(jnp.bfloat16),
                 preferred_element_type=jnp.float32)
    gr = jnp.dot(g.astype(jnp.bfloat16), Rg.astype(jnp.bfloat16),
                 preferred_element_type=jnp.float32)
    return fr * gr


if __name__ == "__main__":
    # Module shapes: features_dim, num_classes, output_dim (kept small).
    batch = 8
    features_dim = 32
    num_classes = 8
    output_dim = 256

    key = jax.random.PRNGKey(0)
    kf, kg, krf, krg = jax.random.split(key, 4)

    # Inputs (minibatch, features_dim) and (minibatch, num_classes).
    f = jax.random.normal(kf, (batch, features_dim), dtype=jnp.float32)
    g = jax.random.normal(kg, (batch, num_classes), dtype=jnp.float32)

    # Fixed random projection matrices (torch.randn in __init__), deterministic here.
    Rf = jax.random.normal(krf, (features_dim, output_dim), dtype=jnp.float32)
    Rg = jax.random.normal(krg, (num_classes, output_dim), dtype=jnp.float32)

    # "__init__": fold 1/sqrt(output_dim) into the fixed Rf once (one-time cost).
    Rf_scaled = Rf / math.sqrt(float(output_dim))

    ref = reference(f, g, Rf, Rg)

    # 1) Exact-precision path (fp32 operands) — strict check vs. reference.
    out_f32 = randomized_multi_linear_map(f, g, Rf_scaled, Rg, scale=1.0,
                                          compute_dtype=jnp.float32)
    out_f32 = jax.block_until_ready(out_f32)
    assert out_f32.shape == (batch, output_dim)
    assert jnp.allclose(out_f32, ref, atol=1e-4, rtol=1e-4), "fp32 mismatch vs reference"

    # 2) Default fast path: bf16 operands, f32 accumulation (halves HBM traffic).
    out_bf16 = randomized_multi_linear_map(f, g, Rf_scaled, Rg, scale=1.0)
    out_bf16 = jax.block_until_ready(out_bf16)
    assert out_bf16.shape == (batch, output_dim)
    ref_b16 = reference_bf16(f, g, Rf_scaled, Rg)
    assert jnp.allclose(out_bf16, ref_b16, atol=1e-2, rtol=1e-2), "bf16 mismatch vs bf16 reference"
    assert jnp.allclose(out_bf16, ref, atol=5e-2, rtol=5e-2), "bf16 too far from fp32 reference"

    print("KERNEL_OK")
</pallas_src>

<mosaic_0001>
module attributes {stable_mosaic.version = 11 : i64} {
  func.func @_rmlm_kernel(%arg0: i32, %arg1: memref<8x32xf32, #tpu.memory_space<vmem>>, %arg2: memref<32x128xf32, #tpu.memory_space<vmem>>, %arg3: memref<8x8xf32, #tpu.memory_space<vmem>>, %arg4: memref<8x128xf32, #tpu.memory_space<vmem>>, %arg5: memref<8x128xf32, #tpu.memory_space<vmem>>) attributes {dimension_semantics = [#tpu.dimension_semantics<parallel>], iteration_bounds = array<i64: 2>, scalar_prefetch = 0 : i64, scratch_operands = 0 : i64, tpu.core_type = #tpu.core_type<tc>, window_params = [{pipeline_mode = #tpu.pipeline_mode<synchronous>, transform_indices = @transform_0, window_bounds = array<i64: 8, 32>}, {transform_indices = @transform_1, window_bounds = array<i64: 32, 128>}, {pipeline_mode = #tpu.pipeline_mode<synchronous>, transform_indices = @transform_2, window_bounds = array<i64: 8, 8>}, {transform_indices = @transform_3, window_bounds = array<i64: 8, 128>}, {transform_indices = @transform_4, window_bounds = array<i64: 8, 128>}]} {
    %c0 = arith.constant 0 : index
    %c0_0 = arith.constant 0 : index
    %0 = vector.load %arg1[%c0, %c0_0] : memref<8x32xf32, #tpu.memory_space<vmem>>, vector<8x32xf32>
    %c0_1 = arith.constant 0 : index
    %c0_2 = arith.constant 0 : index
    %1 = vector.load %arg2[%c0_1, %c0_2] : memref<32x128xf32, #tpu.memory_space<vmem>>, vector<32x128xf32>
    %cst = arith.constant dense<0.000000e+00> : vector<8x128xf32>
    %2 = tpu.matmul %0, %1, %cst {dimension_numbers = #tpu.dot_dimension_numbers<[1], [0], [0], [1], [0, 0, 1, 1], [], []>} : vector<8x32xf32>, vector<32x128xf32>, vector<8x128xf32> -> vector<8x128xf32>
    %c0_3 = arith.constant 0 : index
    %c0_4 = arith.constant 0 : index
    %3 = vector.load %arg3[%c0_3, %c0_4] : memref<8x8xf32, #tpu.memory_space<vmem>>, vector<8x8xf32>
    %c0_5 = arith.constant 0 : index
    %c0_6 = arith.constant 0 : index
    %4 = vector.load %arg4[%c0_5, %c0_6] : memref<8x128xf32, #tpu.memory_space<vmem>>, vector<8x128xf32>
    %cst_7 = arith.constant dense<0.000000e+00> : vector<8x128xf32>
    %5 = tpu.matmul %3, %4, %cst_7 {dimension_numbers = #tpu.dot_dimension_numbers<[1], [0], [0], [1], [0, 0, 1, 1], [], []>} : vector<8x8xf32>, vector<8x128xf32>, vector<8x128xf32> -> vector<8x128xf32>
    %6 = arith.mulf %2, %5 : vector<8x128xf32>
    %c0_8 = arith.constant 0 : index
    %c0_9 = arith.constant 0 : index
    %7 = vector.load %arg5[%c0_8, %c0_9] : memref<8x128xf32, #tpu.memory_space<vmem>>, vector<8x128xf32>
    tpu.vector_store %arg5[%c0_8, %c0_9], %6 {strides = array<i32>} : memref<8x128xf32, #tpu.memory_space<vmem>>, vector<8x128xf32>,
    return
  }
  func.func @transform_0(%arg0: i32) -> (i32, i32) {
    %c0_i32 = arith.constant 0 : i32
    %c0_i32_0 = arith.constant 0 : i32
    %c0_i32_1 = arith.constant 0 : i32
    return %c0_i32, %c0_i32_0 : i32, i32
  }
  func.func @transform_1(%arg0: i32) -> (i32, i32) {
    %c0_i32 = arith.constant 0 : i32
    %c0_i32_0 = arith.constant 0 : i32
    return %c0_i32, %arg0 : i32, i32
  }
  func.func @transform_2(%arg0: i32) -> (i32, i32) {
    %c0_i32 = arith.constant 0 : i32
    %c0_i32_0 = arith.constant 0 : i32
    %c0_i32_1 = arith.constant 0 : i32
    return %c0_i32, %c0_i32_0 : i32, i32
  }
  func.func @transform_3(%arg0: i32) -> (i32, i32) {
    %c0_i32 = arith.constant 0 : i32
    %c0_i32_0 = arith.constant 0 : i32
    return %c0_i32, %arg0 : i32, i32
  }
  func.func @transform_4(%arg0: i32) -> (i32, i32) {
    %c0_i32 = arith.constant 0 : i32
    %c0_i32_0 = arith.constant 0 : i32
    return %c0_i32, %arg0 : i32, i32
  }
}

</mosaic_0001>

<bundles_post_ra>
// kernel: tpu_custom_call.1
= control target key start
LH: loop header
LB: loop body
LE: loop exit
PB: predicated region body
PF: predicated region fallthrough
CT: control target
= control target key end

     0   :  { %s1199_s0 = inlined_call_operand.hbm [shape: f32[8,32], index: 0, kind: input, shape index: {}]   ;;  %s1200_s1 = inlined_call_operand.hbm [shape: f32[32,256], index: 1, kind: input, shape index: {}]   ;;  %s1201_s2 = inlined_call_operand.hbm [shape: f32[8,8], index: 2, kind: input, shape index: {}]   ;;  %s1202_s3 = inlined_call_operand.hbm [shape: f32[8,256], index: 3, kind: input, shape index: {}]   ;;  %s1203_s4 = inlined_call_operand.hbm [shape: f32[8,256], index: 4, kind: output, shape index: {}]  }
   0x1   :  { %1209 = sst [smem:[#allocation16_spill]] %s1199_s0 }
   0x2   :  { %1210 = sst [smem:[#allocation17_spill]] %s1200_s1 }
   0x3   :  { %9 = vsyncpa [#allocation3], 0 }
   0x4   :  { %10 = vsyncpa [#allocation6], 0 }
   0x5   :  { %12 = vsyncpa [#allocation6 + $0x1], 0 }
   0x6   :  { %13 = vsyncpa [#allocation9], 0 }
   0x7   :  { %15 = vsyncpa [#allocation9 + $0x1], 0 }
   0x8   :  { %16 = vsyncpa [#allocation4], 0 }
   0x9   :  { %18 = vsyncpa [#allocation4 + $0x1], 0  ;;  %s922_s15 = smov 0   ;;  %s924_s16 = smov 0  }
   0xa   :  { %s926_s17 = smov 0   ;;  %s928_s18 = smov 0  }
   0xb LB: > { %s943_s19 = sadd.s32 4294967295, %s884_s18   ;;  %s562_s20 = sadd.s32 4294967294, %s884_s18   ;;  %s884_s18 = sphi %s928_s18, %s1234_s18   ;;  %s880_s17 = sphi %s926_s17, %s1233_s17   ;;  %s876_s16 = sphi %s924_s16, %s1232_s16   ;;  %s872_s15 = sphi %s922_s15, %s1231_s15  }
   0xc   : > { %s947_s21 = sadd.s32 1, %s884_s18   ;;  %s52_s22 = sadd.s32 1, %s880_s17 }
   0xd   : > { %s49_s23 = ssub.s32 %s884_s18, %s947_s21  ;;  %p59_p0 = scmp.ne.s32.totalorder %s880_s17, %s876_s16 }
   0xe   : > { %p50_p1 = scmp.eq.s32.totalorder %s49_s23, 0  ;;  %p60_p2 = scmp.eq.s32.totalorder %s884_s18, 0 }
   0xf   : > { %p65_p3 = scmp.ne.s32.totalorder %s876_s16, %s872_s15  ;;  %p1204_p4 = scmp.eq.s32.totalorder %s943_s19, 0 }
  0x10   : > { %s959_s24 = scalar_select %p50_p1, %s880_s17, %s52_s22  }
  0x11   : > { %p961_p5 = por %p60_p2, %p59_p0  ;;  %p967_p6 = por %p1204_p4, %p65_p3 }
  0x12   : > { %p136_p7 = scmp.eq.s32.totalorder %s943_s19, 1  ;;  %p142_p8 = scmp.eq.s32.totalorder %s562_s20, 1 }
  0x13   : > { %s1212_s26 = scalar_select %p967_p6, 1, 0 }
  0x14   : > { %p563_p9 = scmp.ge.s32.totalorder %s884_s18, 1  ;;  %p149_p10 = scmp.lt.s32.totalorder %s884_s18, 3 }
  0x15   : > { %p974_p11 = por %p136_p7, %p59_p0  ;;  %p978_p12 = por %p142_p8, %p65_p3 }
  0x16   : > { %p982_p13 = pnand %p563_p9, %p149_p10  ;;  %s886_s30 = smov [#allocation7]  }
  0x17   : > { %s1213_s27 = scalar_select %p974_p11, 1, 0 }
  0x18   : > { %s1214_s28 = scalar_select %p978_p12, 1, 0 }
  0x19   : > { %s1215_s29 = scalar_select %p982_p13, 1, 0 }
  0x1a   : > { %p626_p2 = pneg %p982_p13  ;;  %s173_s5 = sshll.u32 %s886_s30, 4  ;;  %s174_s5 = int_to_ptr.vmem [resolvable:$true] %s173_s5 }
  0x1b   : > { %p646_p4 = scmp.lt.s32.totalorder %s884_s18, 2  ;;  %p1216_p0 = scmp.eq.s32.totalorder %s943_s19, 0 }
  0x1c   : > { %s887_s8 = smov [#allocation2]   ;;  %s690_s12 = scalar_lea.hbm %s1201_s2, 128 }
  0x1d   : > { %p992_p7 = pnand %p626_p2, %p1216_p0  ;;  %p998_p3 = pnand %p646_p4, %p961_p5 }
  0x1e   : > { %s162_s9 = sshll.u32 %s887_s8, 4  ;;  %p691_p8 = scmp.ne.s32.totalorder %s1201_s2, %s690_s12  ;;  %s1002_s9 = int_to_ptr.vmem [resolvable:$true] %s162_s9 }
  0x1f   : > { %s1218_s7 = scalar_select %p998_p3, 1, 0 }
  0x20   : > { %p692_p9 = pneg %p992_p7  ;;  %p697_p10 = scmp.lt.u32.totalorder %s690_s12, %s1201_s2 }
  0x22   : > { %p693_p4 = pnand %p692_p9, %p691_p8 }
  0x24   : > { %p694_p5 = pneg %p693_p4 }
  0x26   : > { %p699_p2 = pnand %p697_p10, %p694_p5 }
  0x28   : > { %702 = shalt.err (!%p699_p2)
}
  0x29   : > { %s703_s23 = scalar_lea.vmem %s174_s5, 128  ;;  %p711_p11 = scmp.lt.s32.totalorder %s174_s5, %s174_s5 }
  0x2a   : > { %p704_p0 = scmp.ne.s32.totalorder %s174_s5, %s703_s23  ;;  %p712_p6 = scmp.lt.s32.totalorder %s703_s23, %s703_s23 }
  0x2c   : > { %p706_p1 = pnand %p704_p0, %p692_p9  ;;  %p713_p13 = por %p712_p6, %p711_p11 }
  0x2e   : > { %p707_p12 = pneg %p706_p1 }
  0x30   : > { %p714_p3 = pnand %p713_p13, %p707_p12 }
  0x32   : > { %717 = shalt.err (!%p714_p3)
}
  0x33   : > { %632 = dma.hbm_to_vmem [thread:$0]  (!%p992_p7), %s1201_s2, 128, %s174_s5, [#allocation6]  }
  0x34   : > { %s184_s8 = sand.u32 1, %s884_s18   ;;  %s1219_s0 = sld [smem:[#allocation16_spill]] }
  0x3a   : > { %s718_s12 = scalar_lea.hbm %s1219_s0, 128 }
  0x3b   : > { %p719_p1 = scmp.ne.s32.totalorder %s1219_s0, %s718_s12  ;;  %p725_p12 = scmp.lt.u32.totalorder %s718_s12, %s1219_s0 }
  0x3d   : > { %p721_p6 = pnand %p719_p1, %p692_p9 }
  0x3f   : > { %p722_p11 = pneg %p721_p6 }
  0x41   : > { %p727_p13 = pnand %p725_p12, %p722_p11 }
  0x43   : > { %730 = shalt.err (!%p727_p13)
}
  0x44   : > { %s731_s5 = scalar_lea.vmem %s1002_s9, 128  ;;  %p739_p5 = scmp.lt.s32.totalorder %s1002_s9, %s1002_s9 }
  0x45   : > { %p732_p3 = scmp.ne.s32.totalorder %s1002_s9, %s731_s5  ;;  %p740_p10 = scmp.lt.s32.totalorder %s731_s5, %s731_s5 }
  0x47   : > { %p734_p8 = pnand %p732_p3, %p692_p9  ;;  %p741_p2 = por %p740_p10, %p739_p5 }
  0x49   : > { %p735_p4 = pneg %p734_p8 }
  0x4b   : > { %p742_p0 = pnand %p741_p2, %p735_p4 }
  0x4d   : > { %745 = shalt.err (!%p742_p0)
}
  0x4e   : > { %629 = dma.hbm_to_vmem [thread:$0]  (!%p992_p7), %s1219_s0, 128, %s1002_s9, [#allocation3]  }
  0x4f   : > { %s1053_s30 = sand.u32 1, %s880_s17   ;;  %s568_s11 = sshll.u32 %s884_s18, 7 }
  0x50   : > { %s567_s10 = sshll.u32 %s1053_s30, 5  ;;  %s1220_s1 = sld [smem:[#allocation17_spill]] }
  0x51   : > { %s188_s14 = scalar_lea.vmem [#allocation5], %s567_s10  ;;  %s1066_s9 = scalar_lea.sflag [#allocation6], %s184_s8 }
  0x52   : > { %s194_s20 = sshll.u32 %s188_s14, 4  ;;  %p1221_p9 = scmp.ne.s32.totalorder %s1218_s7, 0  ;;  %s1064_s20 = int_to_ptr.vmem [resolvable:$true] %s194_s20 }
  0x54   : > { %p748_p1 = pneg %p1221_p9 }
  0x56   : > { %s1062_s6 = scalar_lea.hbm %s1220_s1, %s568_s11  ;;  %s751_s25 = scalar_lea.hbm %s1220_s1, 1024 }
  0x57   : > { %s746_s22 = scalar_lea.hbm %s1062_s6, 512  ;;  %p752_p12 = scmp.lt.u32.totalorder %s1062_s6, %s1220_s1 }
  0x58   : > { %p747_p7 = scmp.ne.s32.totalorder %s1062_s6, %s746_s22  ;;  %p753_p13 = scmp.lt.u32.totalorder %s751_s25, %s746_s22 }
  0x59   : > { %p755_p8 = scmp.lt.u32.totalorder %s746_s22, %s1062_s6 }
  0x5a   : > { %p749_p6 = pnand %p748_p1, %p747_p7  ;;  %p754_p3 = por %p753_p13, %p752_p12 }
  0x5c   : > { %p750_p11 = pneg %p749_p6  ;;  %p756_p4 = por %p755_p8, %p754_p3 }
  0x5e   : > { %p757_p5 = pnand %p756_p4, %p750_p11 }
  0x60   : > { %760 = shalt.err (!%p757_p5)
}
  0x61   : > { %s761_s8 = scalar_lea.vmem %s1064_s20, 512  ;;  %s888_s10 = smov [#allocation5]  }
  0x62   : > { %p762_p10 = scmp.ne.s32.totalorder %s1064_s20, %s761_s8  ;;  %s766_s14 = sshll.u32 %s888_s10, 4  ;;  %s767_s14 = int_to_ptr.vmem [resolvable:$false] %s766_s14 }
  0x63   : > { %s768_s5 = scalar_lea.vmem %s767_s14, 1024  ;;  %p769_p7 = scmp.lt.s32.totalorder %s1064_s20, %s767_s14 }
  0x64   : > { %p764_p2 = pnand %p762_p10, %p748_p1  ;;  %p770_p6 = scmp.lt.s32.totalorder %s768_s5, %s761_s8 }
  0x66   : > { %p765_p0 = pneg %p764_p2  ;;  %p771_p12 = por %p770_p6, %p769_p7 }
  0x68   : > { %p772_p13 = pnand %p771_p12, %p765_p0 }
  0x6a   : > { %775 = shalt.err (!%p772_p13)
}
  0x6b   : > { %s889_s22 = smov 256   ;;  %s890_s23 = smov 128  }
  0x6c   : > { %s891_s25 = smov 8   ;;  %s569_s12 = sshll.u32 %s1053_s30, 3 }
  0x6d   : > { %636 = dma.hbm_to_vmem [thread:$0]  (!%p1221_p9), %s1062_s6, 512, %s1064_s20, %s1066_s9, %s889_s22, %s890_s23, %s891_s25  }
  0x6e   : > { %s1100_s10 = scalar_lea.hbm %s1202_s3, %s568_s11  ;;  %s208_s14 = scalar_lea.vmem [#allocation8], %s569_s12 }
  0x6f   : > { %s215_s5 = sshll.u32 %s208_s14, 4  ;;  %s205_s0 = scalar_lea.sflag [#allocation9], %s1053_s30  ;;  %s216_s5 = int_to_ptr.vmem [resolvable:$true] %s215_s5 }
  0x70   : > { %s776_s1 = scalar_lea.hbm %s1100_s10, 128  ;;  %s781_s9 = scalar_lea.hbm %s1202_s3, 256 }
  0x71   : > { %p777_p11 = scmp.ne.s32.totalorder %s1100_s10, %s776_s1  ;;  %p782_p4 = scmp.lt.u32.totalorder %s1100_s10, %s1202_s3 }
  0x72   : > { %p783_p5 = scmp.lt.u32.totalorder %s781_s9, %s776_s1  ;;  %p785_p2 = scmp.lt.u32.totalorder %s776_s1, %s1100_s10 }
  0x73   : > { %p779_p3 = pnand %p777_p11, %p748_p1 }
  0x74   : > { %p784_p10 = por %p783_p5, %p782_p4 }
  0x75   : > { %p780_p8 = pneg %p779_p3 }
  0x76   : > { %p786_p0 = por %p785_p2, %p784_p10 }
  0x78   : > { %p787_p7 = pnand %p786_p0, %p780_p8 }
  0x7a   : > { %790 = shalt.err (!%p787_p7)
}
  0x7b   : > { %s791_s30 = scalar_lea.vmem %s216_s5, 128  ;;  %s892_s23 = smov [#allocation8]  }
  0x7c   : > { %p792_p6 = scmp.ne.s32.totalorder %s216_s5, %s791_s30  ;;  %s796_s25 = sshll.u32 %s892_s23, 4  ;;  %s797_s25 = int_to_ptr.vmem [resolvable:$false] %s796_s25 }
  0x7d   : > { %s798_s12 = scalar_lea.vmem %s797_s25, 256  ;;  %p799_p11 = scmp.lt.s32.totalorder %s216_s5, %s797_s25 }
  0x7e   : > { %p794_p12 = pnand %p792_p6, %p748_p1  ;;  %p800_p3 = scmp.lt.s32.totalorder %s798_s12, %s791_s30 }
  0x80   : > { %p795_p13 = pneg %p794_p12  ;;  %p801_p4 = por %p800_p3, %p799_p11 }
  0x82   : > { %p802_p5 = pnand %p801_p4, %p795_p13 }
  0x84   : > { %805 = shalt.err (!%p802_p5)
}
  0x85   : > { %639 = dma.hbm_to_vmem [thread:$0]  (!%p1221_p9), %s1100_s10, 128, %s216_s5, %s205_s0  }
  0x86   : > { %p1222_p8 = scmp.ne.s32.totalorder %s1215_s29, 0 }
  0x87   : > { %p1223_p10 = scmp.eq.s32.totalorder (!%p1222_p8), %s943_s19, 0 }
  0x88   : > { %224 = sbr.rel (%p1222_p8) target bundleno = 393 (0x189), region = 36 }
  0x8f   : > { %851 = dma.done.wait (%p1223_p10), [#allocation3], 128   ;;  %p1224_p1 = pmov %p1223_p10 }
  0x90   : > { %s230_s1 = sand.u32 1, %s943_s19   ;;  %s1130_s13 = sand.u32 1, %s876_s16  }
  0x91   : > { %853 = vsyncadd (%p1224_p1), [#allocation3], 4294967168  ;;  %s573_s8 = sshll.u32 %s1130_s13, 5  ;;  %s231_s7 = scalar_lea.sflag [#allocation6], %s230_s1 }
  0x92   : > { %s234_s14 = scalar_lea.vmem [#allocation5], %s573_s8  ;;  %p1225_p9 = scmp.ne.s32.totalorder %s1212_s26, 0 }
  0x94   : > { %855 = dma.done.wait (%p1225_p9), %s231_s7, 512  }
  0x95   : > { %857 = vsyncadd (%p1225_p9), %s231_s7, 4294966784  ;;  %p1226_p2 = pmov %p1224_p1 }
  0x96   : > { %p1227_p0 = pmov %p1224_p1 }
  0x97   : > { %859 = dma.done.wait (%p1226_p2), [#allocation6], 128  }
  0x98   : > { %861 = vsyncadd (%p1227_p0), [#allocation6], 4294967168  ;;  %s575_s0 = sshll.u32 %s1130_s13, 3  ;;  %s244_s29 = scalar_lea.sflag [#allocation9], %s1130_s13 }
  0x99   : > { %s247_s10 = scalar_lea.vmem [#allocation8], %s575_s0 }
  0x9a   : > { %863 = dma.done.wait (%p1225_p9), %s244_s29, 128  }
  0x9b   : > { %865 = vsyncadd (%p1225_p9), %s244_s29, 4294967168  ;;  %v893_v0 = vmov 0.0|0.0   ;;  %v894_v1 = vmov 0.0   ;;  %vm895_vm0 = vmmov 0   ;;  %v278_v2 = vld [vmem:[%s234_s14] sm:$0xff]  ;;  %v279_v3 = vld [vmem:[%s234_s14 + $0x8] sm:$0xff] }
  0x9c   : > { %606 = vmatprep.subr.bf16.mxu0 %v893_v0  ;;  %601 = vmatprep.subr.mxu1 %v894_v1  ;;  %v280_v4 = vld [vmem:[%s234_s14 + $0x10] sm:$0xff]  ;;  %vm358_vm1 = vcmask 64512   ;;  %v607_v5 = vpack.c.bf16 %v279_v3, %v278_v2  ;;  %v281_v6 = vld [vmem:[%s234_s14 + $0x18] sm:$0xff]  ;;  %v356_v8 = vld [vmem:[#allocation7] sm:$0xff]  ;;  %vm282_vm2 = vcmask 261120   ;;  %s580_s26 = sshll.u32 %s943_s19, 7 }
  0x9d   : > { %603 = vmatprep.mubr.msk.f32.mxu1 %vm895_vm0, %v894_v1  ;;  %598 = vmatprep.mubr.msk.f32.mxu0 %vm895_vm0, %v894_v1  ;;  %v357_v7 = vld [vmem:[%s247_s10] sm:$0xff]  ;;  %v610_v9 = vpack.c.bf16 %v281_v6, %v280_v4  ;;  %v277_v10 = vld [vmem:[#allocation2] sm:$0xff]  ;;  %s276_s5 = scalar_lea.vmem [#allocation10], %s575_s0  ;;  %s1155_s11 = scalar_lea.hbm %s1203_s4, %s580_s26 }
  0x9e   : > { %602 = vmatpush3.msra.mxu1 %v357_v7  ;;  %608 = vmatpush3.bf16.msra.mxu0 %v607_v5  ;;  %s448_s6 = sshll.u32 %s276_s5, 4  ;;  %s435_s22 = scalar_lea.sflag [#allocation4], %s1130_s13  ;;  %s1157_s6 = int_to_ptr.vmem [resolvable:$true] %s448_s6 }
  0x9f   : > { %604 = vmatmul.mubr.msk.f32.vlgmr.msra.gmra.mrb[0].mxu1 %vm358_vm1, %v356_v8  ;;  %609 = vmatprep.subr.bf16.mxu0 %v893_v0  ;;  %s806_s30 = scalar_lea.vmem %s1157_s6, 128  ;;  %p1228_p6 = scmp.ne.s32.totalorder %s1213_s27, 0 }
  0xa0   : > { %p807_p7 = scmp.ne.s32.totalorder %s1157_s6, %s806_s30  ;;  %s896_s19 = smov [#allocation10]  }
  0xa1   : > { %s810_s23 = sshll.u32 %s896_s19, 4  ;;  %s811_s23 = int_to_ptr.vmem [resolvable:$false] %s810_s23 }
  0xa2   : > { %611 = vmatpush3.bf16.msra.mxu0 %v610_v9  ;;  %p808_p12 = pnand %p807_p7, %p1228_p6  ;;  %s812_s25 = scalar_lea.vmem %s811_s23, 256 }
  0xa3   : > { %p813_p11 = scmp.lt.s32.totalorder %s1157_s6, %s811_s23  ;;  %p814_p3 = scmp.lt.s32.totalorder %s812_s25, %s806_s30 }
  0xa4   : > { %p809_p13 = pneg %p808_p12 }
  0xa5   : > { %599 = vmatmul.mubr.msk.f32.vlgmr.msra.gmra.mrb[0].mxu0 %vm282_vm2, %v277_v10  ;;  %p815_p4 = por %p814_p3, %p813_p11 }
  0xa7   : > { %p816_p5 = pnand %p815_p4, %p809_p13 }
 0x172   : > { %v428_v11 = vpop.f32.mrb[0].mxu1 }
 0x173   : > { %v605_v12 = vpop.f32.mrb[1].mxu1 }
 0x178   : > { %v352_v13 = vpop.f32.mrb[0].mxu0 }
 0x179   : > { %v432_v14 = vmul.f32 %v428_v11, %v352_v13  ;;  %v600_v15 = vpop.f32.mrb[1].mxu0 }
 0x17b   : > { %433 = vst [vmem:[%s276_s5] sm:$0xff] %v432_v14 }
 0x17c   : > { %819 = shalt.err (!%p816_p5)
}
 0x17d   : > { %s820_s12 = scalar_lea.hbm %s1155_s11, 128  ;;  %s824_s8 = scalar_lea.hbm %s1203_s4, 256 }
 0x17e   : > { %p821_p8 = scmp.ne.s32.totalorder %s1155_s11, %s820_s12  ;;  %p825_p9 = scmp.lt.u32.totalorder %s1155_s11, %s1203_s4 }
 0x17f   : > { %p826_p2 = scmp.lt.u32.totalorder %s824_s8, %s820_s12  ;;  %p828_p7 = scmp.lt.u32.totalorder %s820_s12, %s1155_s11 }
 0x180   : > { %p822_p10 = pnand %p821_p8, %p1228_p6 }
 0x181   : > { %p827_p0 = por %p826_p2, %p825_p9 }
 0x182   : > { %p823_p1 = pneg %p822_p10 }
 0x183   : > { %p829_p12 = por %p828_p7, %p827_p0 }
 0x185   : > { %p830_p13 = pnand %p829_p12, %p823_p1 }
 0x187   : > { %833 = shalt.err (!%p830_p13)
}
 0x188   : > { %624 = dma.vmem_to_hbm [thread:$0]  (%p1228_p6), %s1157_s6, 128, %s1155_s11, %s435_s22  }
 0x189 PF: > { %s460_s0 = sand.u32 1, %s872_s15   ;;  %p1229_p11 = scmp.ne.s32.totalorder %s1214_s28, 0 }
 0x18a   : > { %p1230_p3 = scmp.ge.s32.totalorder %s884_s18, 2  ;;  %s461_s29 = scalar_lea.sflag [#allocation4], %s460_s0 }
 0x18c   : > { %p641_p4 = pnand %p1230_p3, %p1229_p11 }
 0x18e   : > { %867 = dma.done.wait (!%p641_p4), %s461_s29, 128  }
 0x18f   : > { %869 = vsyncadd (!%p641_p4), %s461_s29, 4294967168  ;;  %p21_p5 = scmp.ge.s32.totalorder %s947_s21, 4   ;;  %s1231_s15 = smov %s876_s16 }
 0x190   : > { %s1232_s16 = smov %s880_s17  ;;  %s1233_s17 = smov %s959_s24 }
 0x191   : > { %s1234_s18 = smov %s947_s21  ;;  %23 = sbr.rel (!%p21_p5) target bundleno = 11 (0xb), region = 103 }
 0x198   :  { %466 = vsyncpa [#allocation3], 1 }
 0x199   :  { %468 = vsyncpa [#allocation3 + $0x1], 1 }
 0x19a   :  { %469 = vsyncpa [#allocation6], 1 }
 0x19b   :  { %471 = vsyncpa [#allocation6 + $0x1], 1 }
 0x19c   :  { %472 = vsyncpa [#allocation9], 1 }
 0x19d   :  { %474 = vsyncpa [#allocation9 + $0x1], 1 }
 0x19e   :  { %475 = vsyncpa [#allocation4], 1 }
 0x19f   :  { %477 = vsyncpa [#allocation4 + $0x1], 1 }

</bundles_post_ra>
